<compile_context>
chip_gen: v5e
topology: v5e:2x2
jax: 0.10.0
libtpu: 0.0.40
codegen_flags: <defaults>
</compile_context>

<pallas_src>
import math
import functools

import jax
import jax.numpy as jnp
from jax import lax
from jax.experimental import pallas as pl
from jax.experimental.pallas import tpu as pltpu


# --------------------------------------------------------------------------- #
# Fused kernel: QKV projection + per-head causal attention + output projection #
# --------------------------------------------------------------------------- #
def _fused_attention_kernel(x_ref, wqkv_ref, bqkv_ref, wp_ref, bp_ref, o_ref,
                            *, n_head, scale, block_b, mxu_dtype):
    """x_ref:(block_b,T,C)  wqkv_ref:(C,3C)  bqkv_ref:(1,3C)
       wp_ref:(C,C)  bp_ref:(1,C)  o_ref:(block_b,T,C)."""
    _, T, C = x_ref.shape
    hd = C // n_head
    M = block_b * T

    def mx(a):  # MXU-operand cast (f32 accumulate regardless)
        return a if mxu_dtype is None else a.astype(mxu_dtype)

    # ---- fused QKV projection on the flattened (block_b*T, C) row block ----
    # (leading-dim merge only; last dim unchanged -> layout-trivial reshape)
    x2 = x_ref[...].reshape(M, C)
    qkv = jnp.dot(mx(x2), mx(wqkv_ref[...]), preferred_element_type=jnp.float32)
    qkv = qkv + bqkv_ref[...].astype(jnp.float32)                 # (M, 3C) f32

    # Scale folded into q once for all heads.
    q3 = mx(qkv[:, :C] * scale).reshape(block_b, T, C)
    k3 = mx(qkv[:, C:2 * C]).reshape(block_b, T, C)
    v3 = mx(qkv[:, 2 * C:]).reshape(block_b, T, C)

    # Causal mask built once (diagonal always unmasked -> finite row max).
    row = lax.broadcasted_iota(jnp.int32, (1, T, T), 1)
    col = lax.broadcasted_iota(jnp.int32, (1, T, T), 2)
    causal = row >= col                                            # (1, T, T)

    wp = mx(wp_ref[...])                                           # (C, C), resident

    # ---- per-head attention, output projection accumulated per head --------
    # Static python loop over heads (n_head small & static); score/PV matmuls
    # are batch-0 dot_generals contracting the last dim -> no transposes.
    acc = jnp.zeros((M, C), jnp.float32)
    for h in range(n_head):
        sl = slice(h * hd, (h + 1) * hd)
        qh, kh, vh = q3[:, :, sl], k3[:, :, sl], v3[:, :, sl]      # (block_b, T, hd)

        s = jnp.einsum("bqd,bkd->bqk", qh, kh,
                       preferred_element_type=jnp.float32)         # (block_b, T, T)
        s = jnp.where(causal, s, -jnp.inf)

        m = jnp.max(s, axis=-1, keepdims=True)
        p = jnp.exp(s - m)
        l = jnp.sum(p, axis=-1, keepdims=True)
        # TODO(synk): attn_drop / resid_drop omitted (module evaluated in eval mode).

        y = jnp.einsum("bqk,bkd->bqd", mx(p), vh,
                       preferred_element_type=jnp.float32)         # (block_b, T, hd)
        y = y / l                                                  # exact normalize

        acc = acc + jnp.dot(mx(y).reshape(M, hd), wp[sl, :],
                            preferred_element_type=jnp.float32)    # (M, C)

    out = acc + bp_ref[...].astype(jnp.float32)
    o_ref[...] = out.reshape(block_b, T, C).astype(o_ref.dtype)


# --------------------------------------------------------------------------- #
# Wrapper                                                                      #
# --------------------------------------------------------------------------- #
def _auto_block_b(B, T, target_rows=256):
    """Largest divisor of B with block_b*T <= target_rows, keeping >= 2 grid
    steps when B >= 2 (so both v7x TensorCores get work)."""
    best = 1
    for d in range(1, B + 1):
        if B % d:
            continue
        if d * T > target_rows:
            continue
        if B >= 2 and B // d < 2:
            continue
        best = d
    return best


def causal_cross_cond_self_attention(x, params, *, n_head, mxu_dtype=None,
                                     block_b=None, vmem_limit_bytes=None):
    """x: [B, T, C].  params: dict from init_params (pre-fused wqkv/bqkv).
    mxu_dtype: e.g. jnp.bfloat16 for faster MXU matmuls (f32 accumulate kept).
    vmem_limit_bytes: raise on v7x if larger block_b / C make weight tiles
    collide with the default scoped VMEM limit."""
    B, T, C = x.shape
    assert C % n_head == 0
    hd = C // n_head

    if block_b is None:
        block_b = _auto_block_b(B, T)
    assert B % block_b == 0
    num_blocks = B // block_b

    return pl.pallas_call(
        functools.partial(_fused_attention_kernel,
                          n_head=n_head, scale=1.0 / math.sqrt(hd),
                          block_b=block_b, mxu_dtype=mxu_dtype),
        out_shape=jax.ShapeDtypeStruct((B, T, C), x.dtype),
        grid_spec=pltpu.PrefetchScalarGridSpec(
            num_scalar_prefetch=0,
            grid=(num_blocks,),
            in_specs=[
                pl.BlockSpec((block_b, T, C), lambda i: (i, 0, 0)),   # x
                pl.BlockSpec((C, 3 * C), lambda i: (0, 0)),           # W_qkv (resident)
                pl.BlockSpec((1, 3 * C), lambda i: (0, 0)),           # b_qkv
                pl.BlockSpec((C, C), lambda i: (0, 0)),               # W_proj (resident)
                pl.BlockSpec((1, C), lambda i: (0, 0)),               # b_proj
            ],
            out_specs=pl.BlockSpec((block_b, T, C), lambda i: (i, 0, 0)),
        ),
        compiler_params=pltpu.CompilerParams(
            dimension_semantics=("parallel",),
            vmem_limit_bytes=vmem_limit_bytes),
    )(x, params["wqkv"], params["bqkv"], params["wp"], params["bp"])


# --------------------------------------------------------------------------- #
# Parameters + pure-JAX reference                                              #
# --------------------------------------------------------------------------- #
def init_params(key, embed_dim):
    """Deterministic synthetic params matching nn.Linear(embed_dim, embed_dim) x4.
    Weights stored as [C_in, C_out]; Q/K/V weights pre-fused into one (C, 3C)
    matrix at init time (not per forward call)."""
    ks = jax.random.split(key, 8)
    bound = 1.0 / math.sqrt(embed_dim)

    def w(k):
        return jax.random.uniform(k, (embed_dim, embed_dim), jnp.float32, -bound, bound)

    def b(k):
        return jax.random.uniform(k, (1, embed_dim), jnp.float32, -bound, bound)

    wqkv = jnp.concatenate([w(ks[0]), w(ks[2]), w(ks[4])], axis=1)   # (C, 3C)
    bqkv = jnp.concatenate([b(ks[1]), b(ks[3]), b(ks[5])], axis=1)   # (1, 3C)
    return {"wqkv": wqkv, "bqkv": bqkv, "wp": w(ks[6]), "bp": b(ks[7])}


def reference_forward(x, params, *, n_head):
    """Pure-JAX replica of the PyTorch forward (dropout in eval mode)."""
    B, T, C = x.shape
    hd = C // n_head
    wqkv, bqkv = params["wqkv"], params["bqkv"]
    q = x @ wqkv[:, :C] + bqkv[:, :C]
    k = x @ wqkv[:, C:2 * C] + bqkv[:, C:2 * C]
    v = x @ wqkv[:, 2 * C:] + bqkv[:, 2 * C:]
    q = q.reshape(B, T, n_head, hd).transpose(0, 2, 1, 3)
    k = k.reshape(B, T, n_head, hd).transpose(0, 2, 1, 3)
    v = v.reshape(B, T, n_head, hd).transpose(0, 2, 1, 3)
    att = jnp.einsum("bhtd,bhsd->bhts", q, k) * (1.0 / math.sqrt(hd))
    mask = jnp.tril(jnp.ones((T, T), jnp.float32))
    att = jnp.where(mask == 0, -jnp.inf, att)
    att = jax.nn.softmax(att, axis=-1)
    y = jnp.einsum("bhts,bhsd->bhtd", att, v)
    y = y.transpose(0, 2, 1, 3).reshape(B, T, C)
    return y @ params["wp"] + params["bp"]


if __name__ == "__main__":
    # NOTE: this demo config is below the architecture floor (C < 128, T <= 16);
    # benchmark/tune at real model shapes (C >= 256, realistic B).
    B, T, C, n_head = 2, 8, 32, 8

    key = jax.random.PRNGKey(0)
    kx, kp = jax.random.split(key)
    x = jax.random.normal(kx, (B, T, C), jnp.float32)
    params = init_params(kp, C)

    out = causal_cross_cond_self_attention(x, params, n_head=n_head)
    out = jax.block_until_ready(out)

    ref = reference_forward(x, params, n_head=n_head)
    assert out.shape == (B, T, C)
    assert jnp.allclose(out, ref, atol=1e-4, rtol=1e-4), "mismatch vs JAX reference"

    print("KERNEL_OK")
</pallas_src>

<mosaic_0001>
module attributes {stable_mosaic.version = 11 : i64} {
  func.func @_fused_attention_kernel(%arg0: i32, %arg1: memref<1x8x32xf32, #tpu.memory_space<vmem>>, %arg2: memref<32x96xf32, #tpu.memory_space<vmem>>, %arg3: memref<1x96xf32, #tpu.memory_space<vmem>>, %arg4: memref<32x32xf32, #tpu.memory_space<vmem>>, %arg5: memref<1x32xf32, #tpu.memory_space<vmem>>, %arg6: memref<1x8x32xf32, #tpu.memory_space<vmem>>) attributes {dimension_semantics = [#tpu.dimension_semantics<parallel>], iteration_bounds = array<i64: 2>, scalar_prefetch = 0 : i64, scratch_operands = 0 : i64, tpu.core_type = #tpu.core_type<tc>, window_params = [{transform_indices = @transform_0, window_bounds = array<i64: 1, 8, 32>}, {pipeline_mode = #tpu.pipeline_mode<synchronous>, transform_indices = @transform_1, window_bounds = array<i64: 32, 96>}, {pipeline_mode = #tpu.pipeline_mode<synchronous>, transform_indices = @transform_2, window_bounds = array<i64: 1, 96>}, {pipeline_mode = #tpu.pipeline_mode<synchronous>, transform_indices = @transform_3, window_bounds = array<i64: 32, 32>}, {pipeline_mode = #tpu.pipeline_mode<synchronous>, transform_indices = @transform_4, window_bounds = array<i64: 1, 32>}, {transform_indices = @transform_5, window_bounds = array<i64: 1, 8, 32>}]} {
    %c0 = arith.constant 0 : index
    %c0_0 = arith.constant 0 : index
    %c0_1 = arith.constant 0 : index
    %0 = vector.load %arg1[%c0, %c0_0, %c0_1] : memref<1x8x32xf32, #tpu.memory_space<vmem>>, vector<1x8x32xf32>
    %1 = vector.shape_cast %0 : vector<1x8x32xf32> to vector<8x32xf32>
    %c0_2 = arith.constant 0 : index
    %c0_3 = arith.constant 0 : index
    %2 = vector.load %arg2[%c0_2, %c0_3] : memref<32x96xf32, #tpu.memory_space<vmem>>, vector<32x96xf32>
    %cst = arith.constant dense<0.000000e+00> : vector<8x96xf32>
    %3 = tpu.matmul %1, %2, %cst {dimension_numbers = #tpu.dot_dimension_numbers<[1], [0], [0], [1], [0, 0, 1, 1], [], []>} : vector<8x32xf32>, vector<32x96xf32>, vector<8x96xf32> -> vector<8x96xf32>
    %c0_4 = arith.constant 0 : index
    %c0_5 = arith.constant 0 : index
    %4 = vector.load %arg3[%c0_4, %c0_5] : memref<1x96xf32, #tpu.memory_space<vmem>>, vector<1x96xf32>
    %5 = vector.broadcast %4 : vector<1x96xf32> to vector<8x96xf32>
    %6 = arith.addf %3, %5 : vector<8x96xf32>
    %7 = vector.extract_strided_slice %6 {offsets = [0, 0], sizes = [8, 32], strides = [1, 1]} : vector<8x96xf32> to vector<8x32xf32>
    %cst_6 = arith.constant 5.000000e-01 : f32
    %8 = vector.broadcast %cst_6 : f32 to vector<8x32xf32>
    %9 = arith.mulf %7, %8 : vector<8x32xf32>
    %10 = vector.shape_cast %9 : vector<8x32xf32> to vector<1x8x32xf32>
    %11 = vector.extract_strided_slice %6 {offsets = [0, 32], sizes = [8, 32], strides = [1, 1]} : vector<8x96xf32> to vector<8x32xf32>
    %12 = vector.shape_cast %11 : vector<8x32xf32> to vector<1x8x32xf32>
    %13 = vector.extract_strided_slice %6 {offsets = [0, 64], sizes = [8, 32], strides = [1, 1]} : vector<8x96xf32> to vector<8x32xf32>
    %14 = vector.shape_cast %13 : vector<8x32xf32> to vector<1x8x32xf32>
    %15 = tpu.iota {dimensions = array<i32: 1>} : vector<1x8x8xi32>
    %16 = tpu.iota {dimensions = array<i32: 2>} : vector<1x8x8xi32>
    %17 = arith.cmpi sge, %15, %16 : vector<1x8x8xi32>
    %c0_7 = arith.constant 0 : index
    %c0_8 = arith.constant 0 : index
    %18 = vector.load %arg4[%c0_7, %c0_8] : memref<32x32xf32, #tpu.memory_space<vmem>>, vector<32x32xf32>
    %cst_9 = arith.constant 0.000000e+00 : f32
    %19 = vector.broadcast %cst_9 : f32 to vector<8x32xf32>
    %20 = vector.extract_strided_slice %10 {offsets = [0, 0, 0], sizes = [1, 8, 4], strides = [1, 1, 1]} : vector<1x8x32xf32> to vector<1x8x4xf32>
    %21 = vector.extract_strided_slice %12 {offsets = [0, 0, 0], sizes = [1, 8, 4], strides = [1, 1, 1]} : vector<1x8x32xf32> to vector<1x8x4xf32>
    %22 = vector.extract_strided_slice %14 {offsets = [0, 0, 0], sizes = [1, 8, 4], strides = [1, 1, 1]} : vector<1x8x32xf32> to vector<1x8x4xf32>
    "tpu.trace_start"() <{level = 10 : i32, message = "bqd,bkd->bqk"}> : () -> ()
    %cst_10 = arith.constant dense<0.000000e+00> : vector<1x8x8xf32>
    %23 = tpu.matmul %20, %21, %cst_10 {dimension_numbers = #tpu.dot_dimension_numbers<[2], [2], [1], [1], [0, 0, 0, 1, 1, 1], [0], [0]>} : vector<1x8x4xf32>, vector<1x8x4xf32>, vector<1x8x8xf32> -> vector<1x8x8xf32>
    %cst_11 = arith.constant 0xFF800000 : f32
    "tpu.trace_stop"() : () -> ()
    %24 = vector.broadcast %cst_11 : f32 to vector<1x8x8xf32>
    %25 = arith.select %17, %23, %24 : vector<1x8x8xi1>, vector<1x8x8xf32>
    %cst_12 = arith.constant dense<0xFF800000> : vector<1x8xf32>
    %26 = vector.multi_reduction <maximumf>, %25, %cst_12 [2] : vector<1x8x8xf32> to vector<1x8xf32>
    %27 = vector.shape_cast %26 : vector<1x8xf32> to vector<1x8x1xf32>
    %28 = vector.broadcast %27 : vector<1x8x1xf32> to vector<1x8x8xf32>
    %29 = arith.subf %25, %28 : vector<1x8x8xf32>
    %30 = math.exp %29 : vector<1x8x8xf32>
    %cst_13 = arith.constant dense<0.000000e+00> : vector<1x8xf32>
    %31 = vector.multi_reduction <add>, %30, %cst_13 [2] : vector<1x8x8xf32> to vector<1x8xf32>
    %32 = vector.shape_cast %31 : vector<1x8xf32> to vector<1x8x1xf32>
    "tpu.trace_start"() <{level = 10 : i32, message = "bqk,bkd->bqd"}> : () -> ()
    %cst_14 = arith.constant dense<0.000000e+00> : vector<1x8x4xf32>
    %33 = tpu.matmul %30, %22, %cst_14 {dimension_numbers = #tpu.dot_dimension_numbers<[2], [1], [1], [2], [0, 0, 0, 1, 1, 2], [0], [0]>} : vector<1x8x8xf32>, vector<1x8x4xf32>, vector<1x8x4xf32> -> vector<1x8x4xf32>
    "tpu.trace_stop"() : () -> ()
    %34 = vector.broadcast %32 : vector<1x8x1xf32> to vector<1x8x4xf32>
    %35 = arith.divf %33, %34 : vector<1x8x4xf32>
    %36 = vector.shape_cast %35 : vector<1x8x4xf32> to vector<8x4xf32>
    %37 = vector.extract_strided_slice %18 {offsets = [0, 0], sizes = [4, 32], strides = [1, 1]} : vector<32x32xf32> to vector<4x32xf32>
    %cst_15 = arith.constant dense<0.000000e+00> : vector<8x32xf32>
    %38 = tpu.matmul %36, %37, %cst_15 {dimension_numbers = #tpu.dot_dimension_numbers<[1], [0], [0], [1], [0, 0, 1, 1], [], []>} : vector<8x4xf32>, vector<4x32xf32>, vector<8x32xf32> -> vector<8x32xf32>
    %39 = arith.addf %19, %38 : vector<8x32xf32>
    %40 = vector.extract_strided_slice %10 {offsets = [0, 0, 4], sizes = [1, 8, 4], strides = [1, 1, 1]} : vector<1x8x32xf32> to vector<1x8x4xf32>
    %41 = vector.extract_strided_slice %12 {offsets = [0, 0, 4], sizes = [1, 8, 4], strides = [1, 1, 1]} : vector<1x8x32xf32> to vector<1x8x4xf32>
    %42 = vector.extract_strided_slice %14 {offsets = [0, 0, 4], sizes = [1, 8, 4], strides = [1, 1, 1]} : vector<1x8x32xf32> to vector<1x8x4xf32>
    "tpu.trace_start"() <{level = 10 : i32, message = "bqd,bkd->bqk"}> : () -> ()
    %cst_16 = arith.constant dense<0.000000e+00> : vector<1x8x8xf32>
    %43 = tpu.matmul %40, %41, %cst_16 {dimension_numbers = #tpu.dot_dimension_numbers<[2], [2], [1], [1], [0, 0, 0, 1, 1, 1], [0], [0]>} : vector<1x8x4xf32>, vector<1x8x4xf32>, vector<1x8x8xf32> -> vector<1x8x8xf32>
    %cst_17 = arith.constant 0xFF800000 : f32
    "tpu.trace_stop"() : () -> ()
    %44 = vector.broadcast %cst_17 : f32 to vector<1x8x8xf32>
    %45 = arith.select %17, %43, %44 : vector<1x8x8xi1>, vector<1x8x8xf32>
    %cst_18 = arith.constant dense<0xFF800000> : vector<1x8xf32>
    %46 = vector.multi_reduction <maximumf>, %45, %cst_18 [2] : vector<1x8x8xf32> to vector<1x8xf32>
    %47 = vector.shape_cast %46 : vector<1x8xf32> to vector<1x8x1xf32>
    %48 = vector.broadcast %47 : vector<1x8x1xf32> to vector<1x8x8xf32>
    %49 = arith.subf %45, %48 : vector<1x8x8xf32>
    %50 = math.exp %49 : vector<1x8x8xf32>
    %cst_19 = arith.constant dense<0.000000e+00> : vector<1x8xf32>
    %51 = vector.multi_reduction <add>, %50, %cst_19 [2] : vector<1x8x8xf32> to vector<1x8xf32>
    %52 = vector.shape_cast %51 : vector<1x8xf32> to vector<1x8x1xf32>
    "tpu.trace_start"() <{level = 10 : i32, message = "bqk,bkd->bqd"}> : () -> ()
    %cst_20 = arith.constant dense<0.000000e+00> : vector<1x8x4xf32>
    %53 = tpu.matmul %50, %42, %cst_20 {dimension_numbers = #tpu.dot_dimension_numbers<[2], [1], [1], [2], [0, 0, 0, 1, 1, 2], [0], [0]>} : vector<1x8x8xf32>, vector<1x8x4xf32>, vector<1x8x4xf32> -> vector<1x8x4xf32>
    "tpu.trace_stop"() : () -> ()
    %54 = vector.broadcast %52 : vector<1x8x1xf32> to vector<1x8x4xf32>
    %55 = arith.divf %53, %54 : vector<1x8x4xf32>
    %56 = vector.shape_cast %55 : vector<1x8x4xf32> to vector<8x4xf32>
    %57 = vector.extract_strided_slice %18 {offsets = [4, 0], sizes = [4, 32], strides = [1, 1]} : vector<32x32xf32> to vector<4x32xf32>
    %cst_21 = arith.constant dense<0.000000e+00> : vector<8x32xf32>
    %58 = tpu.matmul %56, %57, %cst_21 {dimension_numbers = #tpu.dot_dimension_numbers<[1], [0], [0], [1], [0, 0, 1, 1], [], []>} : vector<8x4xf32>, vector<4x32xf32>, vector<8x32xf32> -> vector<8x32xf32>
    %59 = arith.addf %39, %58 : vector<8x32xf32>
    %60 = vector.extract_strided_slice %10 {offsets = [0, 0, 8], sizes = [1, 8, 4], strides = [1, 1, 1]} : vector<1x8x32xf32> to vector<1x8x4xf32>
    %61 = vector.extract_strided_slice %12 {offsets = [0, 0, 8], sizes = [1, 8, 4], strides = [1, 1, 1]} : vector<1x8x32xf32> to vector<1x8x4xf32>
    %62 = vector.extract_strided_slice %14 {offsets = [0, 0, 8], sizes = [1, 8, 4], strides = [1, 1, 1]} : vector<1x8x32xf32> to vector<1x8x4xf32>
    "tpu.trace_start"() <{level = 10 : i32, message = "bqd,bkd->bqk"}> : () -> ()
    %cst_22 = arith.constant dense<0.000000e+00> : vector<1x8x8xf32>
    %63 = tpu.matmul %60, %61, %cst_22 {dimension_numbers = #tpu.dot_dimension_numbers<[2], [2], [1], [1], [0, 0, 0, 1, 1, 1], [0], [0]>} : vector<1x8x4xf32>, vector<1x8x4xf32>, vector<1x8x8xf32> -> vector<1x8x8xf32>
    %cst_23 = arith.constant 0xFF800000 : f32
    "tpu.trace_stop"() : () -> ()
    %64 = vector.broadcast %cst_23 : f32 to vector<1x8x8xf32>
    %65 = arith.select %17, %63, %64 : vector<1x8x8xi1>, vector<1x8x8xf32>
    %cst_24 = arith.constant dense<0xFF800000> : vector<1x8xf32>
    %66 = vector.multi_reduction <maximumf>, %65, %cst_24 [2] : vector<1x8x8xf32> to vector<1x8xf32>
    %67 = vector.shape_cast %66 : vector<1x8xf32> to vector<1x8x1xf32>
    %68 = vector.broadcast %67 : vector<1x8x1xf32> to vector<1x8x8xf32>
    %69 = arith.subf %65, %68 : vector<1x8x8xf32>
    %70 = math.exp %69 : vector<1x8x8xf32>
    %cst_25 = arith.constant dense<0.000000e+00> : vector<1x8xf32>
    %71 = vector.multi_reduction <add>, %70, %cst_25 [2] : vector<1x8x8xf32> to vector<1x8xf32>
    %72 = vector.shape_cast %71 : vector<1x8xf32> to vector<1x8x1xf32>
    "tpu.trace_start"() <{level = 10 : i32, message = "bqk,bkd->bqd"}> : () -> ()
    %cst_26 = arith.constant dense<0.000000e+00> : vector<1x8x4xf32>
    %73 = tpu.matmul %70, %62, %cst_26 {dimension_numbers = #tpu.dot_dimension_numbers<[2], [1], [1], [2], [0, 0, 0, 1, 1, 2], [0], [0]>} : vector<1x8x8xf32>, vector<1x8x4xf32>, vector<1x8x4xf32> -> vector<1x8x4xf32>
    "tpu.trace_stop"() : () -> ()
    %74 = vector.broadcast %72 : vector<1x8x1xf32> to vector<1x8x4xf32>
    %75 = arith.divf %73, %74 : vector<1x8x4xf32>
    %76 = vector.shape_cast %75 : vector<1x8x4xf32> to vector<8x4xf32>
    %77 = vector.extract_strided_slice %18 {offsets = [8, 0], sizes = [4, 32], strides = [1, 1]} : vector<32x32xf32> to vector<4x32xf32>
    %cst_27 = arith.constant dense<0.000000e+00> : vector<8x32xf32>
    %78 = tpu.matmul %76, %77, %cst_27 {dimension_numbers = #tpu.dot_dimension_numbers<[1], [0], [0], [1], [0, 0, 1, 1], [], []>} : vector<8x4xf32>, vector<4x32xf32>, vector<8x32xf32> -> vector<8x32xf32>
    %79 = arith.addf %59, %78 : vector<8x32xf32>
    %80 = vector.extract_strided_slice %10 {offsets = [0, 0, 12], sizes = [1, 8, 4], strides = [1, 1, 1]} : vector<1x8x32xf32> to vector<1x8x4xf32>
    %81 = vector.extract_strided_slice %12 {offsets = [0, 0, 12], sizes = [1, 8, 4], strides = [1, 1, 1]} : vector<1x8x32xf32> to vector<1x8x4xf32>
    %82 = vector.extract_strided_slice %14 {offsets = [0, 0, 12], sizes = [1, 8, 4], strides = [1, 1, 1]} : vector<1x8x32xf32> to vector<1x8x4xf32>
    "tpu.trace_start"() <{level = 10 : i32, message = "bqd,bkd->bqk"}> : () -> ()
    %cst_28 = arith.constant dense<0.000000e+00> : vector<1x8x8xf32>
    %83 = tpu.matmul %80, %81, %cst_28 {dimension_numbers = #tpu.dot_dimension_numbers<[2], [2], [1], [1], [0, 0, 0, 1, 1, 1], [0], [0]>} : vector<1x8x4xf32>, vector<1x8x4xf32>, vector<1x8x8xf32> -> vector<1x8x8xf32>
    %cst_29 = arith.constant 0xFF800000 : f32
    "tpu.trace_stop"() : () -> ()
    %84 = vector.broadcast %cst_29 : f32 to vector<1x8x8xf32>
    %85 = arith.select %17, %83, %84 : vector<1x8x8xi1>, vector<1x8x8xf32>
    %cst_30 = arith.constant dense<0xFF800000> : vector<1x8xf32>
    %86 = vector.multi_reduction <maximumf>, %85, %cst_30 [2] : vector<1x8x8xf32> to vector<1x8xf32>
    %87 = vector.shape_cast %86 : vector<1x8xf32> to vector<1x8x1xf32>
    %88 = vector.broadcast %87 : vector<1x8x1xf32> to vector<1x8x8xf32>
    %89 = arith.subf %85, %88 : vector<1x8x8xf32>
    %90 = math.exp %89 : vector<1x8x8xf32>
    %cst_31 = arith.constant dense<0.000000e+00> : vector<1x8xf32>
    %91 = vector.multi_reduction <add>, %90, %cst_31 [2] : vector<1x8x8xf32> to vector<1x8xf32>
    %92 = vector.shape_cast %91 : vector<1x8xf32> to vector<1x8x1xf32>
    "tpu.trace_start"() <{level = 10 : i32, message = "bqk,bkd->bqd"}> : () -> ()
    %cst_32 = arith.constant dense<0.000000e+00> : vector<1x8x4xf32>
    %93 = tpu.matmul %90, %82, %cst_32 {dimension_numbers = #tpu.dot_dimension_numbers<[2], [1], [1], [2], [0, 0, 0, 1, 1, 2], [0], [0]>} : vector<1x8x8xf32>, vector<1x8x4xf32>, vector<1x8x4xf32> -> vector<1x8x4xf32>
    "tpu.trace_stop"() : () -> ()
    %94 = vector.broadcast %92 : vector<1x8x1xf32> to vector<1x8x4xf32>
    %95 = arith.divf %93, %94 : vector<1x8x4xf32>
    %96 = vector.shape_cast %95 : vector<1x8x4xf32> to vector<8x4xf32>
    %97 = vector.extract_strided_slice %18 {offsets = [12, 0], sizes = [4, 32], strides = [1, 1]} : vector<32x32xf32> to vector<4x32xf32>
    %cst_33 = arith.constant dense<0.000000e+00> : vector<8x32xf32>
    %98 = tpu.matmul %96, %97, %cst_33 {dimension_numbers = #tpu.dot_dimension_numbers<[1], [0], [0], [1], [0, 0, 1, 1], [], []>} : vector<8x4xf32>, vector<4x32xf32>, vector<8x32xf32> -> vector<8x32xf32>
    %99 = arith.addf %79, %98 : vector<8x32xf32>
    %100 = vector.extract_strided_slice %10 {offsets = [0, 0, 16], sizes = [1, 8, 4], strides = [1, 1, 1]} : vector<1x8x32xf32> to vector<1x8x4xf32>
    %101 = vector.extract_strided_slice %12 {offsets = [0, 0, 16], sizes = [1, 8, 4], strides = [1, 1, 1]} : vector<1x8x32xf32> to vector<1x8x4xf32>
    %102 = vector.extract_strided_slice %14 {offsets = [0, 0, 16], sizes = [1, 8, 4], strides = [1, 1, 1]} : vector<1x8x32xf32> to vector<1x8x4xf32>
    "tpu.trace_start"() <{level = 10 : i32, message = "bqd,bkd->bqk"}> : () -> ()
    %cst_34 = arith.constant dense<0.000000e+00> : vector<1x8x8xf32>
    %103 = tpu.matmul %100, %101, %cst_34 {dimension_numbers = #tpu.dot_dimension_numbers<[2], [2], [1], [1], [0, 0, 0, 1, 1, 1], [0], [0]>} : vector<1x8x4xf32>, vector<1x8x4xf32>, vector<1x8x8xf32> -> vector<1x8x8xf32>
    %cst_35 = arith.constant 0xFF800000 : f32
    "tpu.trace_stop"() : () -> ()
    %104 = vector.broadcast %cst_35 : f32 to vector<1x8x8xf32>
    %105 = arith.select %17, %103, %104 : vector<1x8x8xi1>, vector<1x8x8xf32>
    %cst_36 = arith.constant dense<0xFF800000> : vector<1x8xf32>
    %106 = vector.multi_reduction <maximumf>, %105, %cst_36 [2] : vector<1x8x8xf32> to vector<1x8xf32>
    %107 = vector.shape_cast %106 : vector<1x8xf32> to vector<1x8x1xf32>
    %108 = vector.broadcast %107 : vector<1x8x1xf32> to vector<1x8x8xf32>
    %109 = arith.subf %105, %108 : vector<1x8x8xf32>
    %110 = math.exp %109 : vector<1x8x8xf32>
    %cst_37 = arith.constant dense<0.000000e+00> : vector<1x8xf32>
    %111 = vector.multi_reduction <add>, %110, %cst_37 [2] : vector<1x8x8xf32> to vector<1x8xf32>
    %112 = vector.shape_cast %111 : vector<1x8xf32> to vector<1x8x1xf32>
    "tpu.trace_start"() <{level = 10 : i32, message = "bqk,bkd->bqd"}> : () -> ()
    %cst_38 = arith.constant dense<0.000000e+00> : vector<1x8x4xf32>
    %113 = tpu.matmul %110, %102, %cst_38 {dimension_numbers = #tpu.dot_dimension_numbers<[2], [1], [1], [2], [0, 0, 0, 1, 1, 2], [0], [0]>} : vector<1x8x8xf32>, vector<1x8x4xf32>, vector<1x8x4xf32> -> vector<1x8x4xf32>
    "tpu.trace_stop"() : () -> ()
    %114 = vector.broadcast %112 : vector<1x8x1xf32> to vector<1x8x4xf32>
    %115 = arith.divf %113, %114 : vector<1x8x4xf32>
    %116 = vector.shape_cast %115 : vector<1x8x4xf32> to vector<8x4xf32>
    %117 = vector.extract_strided_slice %18 {offsets = [16, 0], sizes = [4, 32], strides = [1, 1]} : vector<32x32xf32> to vector<4x32xf32>
    %cst_39 = arith.constant dense<0.000000e+00> : vector<8x32xf32>
    %118 = tpu.matmul %116, %117, %cst_39 {dimension_numbers = #tpu.dot_dimension_numbers<[1], [0], [0], [1], [0, 0, 1, 1], [], []>} : vector<8x4xf32>, vector<4x32xf32>, vector<8x32xf32> -> vector<8x32xf32>
    %119 = arith.addf %99, %118 : vector<8x32xf32>
    %120 = vector.extract_strided_slice %10 {offsets = [0, 0, 20], sizes = [1, 8, 4], strides = [1, 1, 1]} : vector<1x8x32xf32> to vector<1x8x4xf32>
    %121 = vector.extract_strided_slice %12 {offsets = [0, 0, 20], sizes = [1, 8, 4], strides = [1, 1, 1]} : vector<1x8x32xf32> to vector<1x8x4xf32>
    %122 = vector.extract_strided_slice %14 {offsets = [0, 0, 20], sizes = [1, 8, 4], strides = [1, 1, 1]} : vector<1x8x32xf32> to vector<1x8x4xf32>
    "tpu.trace_start"() <{level = 10 : i32, message = "bqd,bkd->bqk"}> : () -> ()
    %cst_40 = arith.constant dense<0.000000e+00> : vector<1x8x8xf32>
    %123 = tpu.matmul %120, %121, %cst_40 {dimension_numbers = #tpu.dot_dimension_numbers<[2], [2], [1], [1], [0, 0, 0, 1, 1, 1], [0], [0]>} : vector<1x8x4xf32>, vector<1x8x4xf32>, vector<1x8x8xf32> -> vector<1x8x8xf32>
    %cst_41 = arith.constant 0xFF800000 : f32
    "tpu.trace_stop"() : () -> ()
    %124 = vector.broadcast %cst_41 : f32 to vector<1x8x8xf32>
    %125 = arith.select %17, %123, %124 : vector<1x8x8xi1>, vector<1x8x8xf32>
    %cst_42 = arith.constant dense<0xFF800000> : vector<1x8xf32>
    %126 = vector.multi_reduction <maximumf>, %125, %cst_42 [2] : vector<1x8x8xf32> to vector<1x8xf32>
    %127 = vector.shape_cast %126 : vector<1x8xf32> to vector<1x8x1xf32>
    %128 = vector.broadcast %127 : vector<1x8x1xf32> to vector<1x8x8xf32>
    %129 = arith.subf %125, %128 : vector<1x8x8xf32>
    %130 = math.exp %129 : vector<1x8x8xf32>
    %cst_43 = arith.constant dense<0.000000e+00> : vector<1x8xf32>
    %131 = vector.multi_reduction <add>, %130, %cst_43 [2] : vector<1x8x8xf32> to vector<1x8xf32>
    %132 = vector.shape_cast %131 : vector<1x8xf32> to vector<1x8x1xf32>
    "tpu.trace_start"() <{level = 10 : i32, message = "bqk,bkd->bqd"}> : () -> ()
    %cst_44 = arith.constant dense<0.000000e+00> : vector<1x8x4xf32>
    %133 = tpu.matmul %130, %122, %cst_44 {dimension_numbers = #tpu.dot_dimension_numbers<[2], [1], [1], [2], [0, 0, 0, 1, 1, 2], [0], [0]>} : vector<1x8x8xf32>, vector<1x8x4xf32>, vector<1x8x4xf32> -> vector<1x8x4xf32>
    "tpu.trace_stop"() : () -> ()
    %134 = vector.broadcast %132 : vector<1x8x1xf32> to vector<1x8x4xf32>
    %135 = arith.divf %133, %134 : vector<1x8x4xf32>
    %136 = vector.shape_cast %135 : vector<1x8x4xf32> to vector<8x4xf32>
    %137 = vector.extract_strided_slice %18 {offsets = [20, 0], sizes = [4, 32], strides = [1, 1]} : vector<32x32xf32> to vector<4x32xf32>
    %cst_45 = arith.constant dense<0.000000e+00> : vector<8x32xf32>
    %138 = tpu.matmul %136, %137, %cst_45 {dimension_numbers = #tpu.dot_dimension_numbers<[1], [0], [0], [1], [0, 0, 1, 1], [], []>} : vector<8x4xf32>, vector<4x32xf32>, vector<8x32xf32> -> vector<8x32xf32>
    %139 = arith.addf %119, %138 : vector<8x32xf32>
    %140 = vector.extract_strided_slice %10 {offsets = [0, 0, 24], sizes = [1, 8, 4], strides = [1, 1, 1]} : vector<1x8x32xf32> to vector<1x8x4xf32>
    %141 = vector.extract_strided_slice %12 {offsets = [0, 0, 24], sizes = [1, 8, 4], strides = [1, 1, 1]} : vector<1x8x32xf32> to vector<1x8x4xf32>
    %142 = vector.extract_strided_slice %14 {offsets = [0, 0, 24], sizes = [1, 8, 4], strides = [1, 1, 1]} : vector<1x8x32xf32> to vector<1x8x4xf32>
    "tpu.trace_start"() <{level = 10 : i32, message = "bqd,bkd->bqk"}> : () -> ()
    %cst_46 = arith.constant dense<0.000000e+00> : vector<1x8x8xf32>
    %143 = tpu.matmul %140, %141, %cst_46 {dimension_numbers = #tpu.dot_dimension_numbers<[2], [2], [1], [1], [0, 0, 0, 1, 1, 1], [0], [0]>} : vector<1x8x4xf32>, vector<1x8x4xf32>, vector<1x8x8xf32> -> vector<1x8x8xf32>
    %cst_47 = arith.constant 0xFF800000 : f32
    "tpu.trace_stop"() : () -> ()
    %144 = vector.broadcast %cst_47 : f32 to vector<1x8x8xf32>
    %145 = arith.select %17, %143, %144 : vector<1x8x8xi1>, vector<1x8x8xf32>
    %cst_48 = arith.constant dense<0xFF800000> : vector<1x8xf32>
    %146 = vector.multi_reduction <maximumf>, %145, %cst_48 [2] : vector<1x8x8xf32> to vector<1x8xf32>
    %147 = vector.shape_cast %146 : vector<1x8xf32> to vector<1x8x1xf32>
    %148 = vector.broadcast %147 : vector<1x8x1xf32> to vector<1x8x8xf32>
    %149 = arith.subf %145, %148 : vector<1x8x8xf32>
    %150 = math.exp %149 : vector<1x8x8xf32>
    %cst_49 = arith.constant dense<0.000000e+00> : vector<1x8xf32>
    %151 = vector.multi_reduction <add>, %150, %cst_49 [2] : vector<1x8x8xf32> to vector<1x8xf32>
    %152 = vector.shape_cast %151 : vector<1x8xf32> to vector<1x8x1xf32>
    "tpu.trace_start"() <{level = 10 : i32, message = "bqk,bkd->bqd"}> : () -> ()
    %cst_50 = arith.constant dense<0.000000e+00> : vector<1x8x4xf32>
    %153 = tpu.matmul %150, %142, %cst_50 {dimension_numbers = #tpu.dot_dimension_numbers<[2], [1], [1], [2], [0, 0, 0, 1, 1, 2], [0], [0]>} : vector<1x8x8xf32>, vector<1x8x4xf32>, vector<1x8x4xf32> -> vector<1x8x4xf32>
    "tpu.trace_stop"() : () -> ()
    %154 = vector.broadcast %152 : vector<1x8x1xf32> to vector<1x8x4xf32>
    %155 = arith.divf %153, %154 : vector<1x8x4xf32>
    %156 = vector.shape_cast %155 : vector<1x8x4xf32> to vector<8x4xf32>
    %157 = vector.extract_strided_slice %18 {offsets = [24, 0], sizes = [4, 32], strides = [1, 1]} : vector<32x32xf32> to vector<4x32xf32>
    %cst_51 = arith.constant dense<0.000000e+00> : vector<8x32xf32>
    %158 = tpu.matmul %156, %157, %cst_51 {dimension_numbers = #tpu.dot_dimension_numbers<[1], [0], [0], [1], [0, 0, 1, 1], [], []>} : vector<8x4xf32>, vector<4x32xf32>, vector<8x32xf32> -> vector<8x32xf32>
    %159 = arith.addf %139, %158 : vector<8x32xf32>
    %160 = vector.extract_strided_slice %10 {offsets = [0, 0, 28], sizes = [1, 8, 4], strides = [1, 1, 1]} : vector<1x8x32xf32> to vector<1x8x4xf32>
    %161 = vector.extract_strided_slice %12 {offsets = [0, 0, 28], sizes = [1, 8, 4], strides = [1, 1, 1]} : vector<1x8x32xf32> to vector<1x8x4xf32>
    %162 = vector.extract_strided_slice %14 {offsets = [0, 0, 28], sizes = [1, 8, 4], strides = [1, 1, 1]} : vector<1x8x32xf32> to vector<1x8x4xf32>
    "tpu.trace_start"() <{level = 10 : i32, message = "bqd,bkd->bqk"}> : () -> ()
    %cst_52 = arith.constant dense<0.000000e+00> : vector<1x8x8xf32>
    %163 = tpu.matmul %160, %161, %cst_52 {dimension_numbers = #tpu.dot_dimension_numbers<[2], [2], [1], [1], [0, 0, 0, 1, 1, 1], [0], [0]>} : vector<1x8x4xf32>, vector<1x8x4xf32>, vector<1x8x8xf32> -> vector<1x8x8xf32>
    %cst_53 = arith.constant 0xFF800000 : f32
    "tpu.trace_stop"() : () -> ()
    %164 = vector.broadcast %cst_53 : f32 to vector<1x8x8xf32>
    %165 = arith.select %17, %163, %164 : vector<1x8x8xi1>, vector<1x8x8xf32>
    %cst_54 = arith.constant dense<0xFF800000> : vector<1x8xf32>
    %166 = vector.multi_reduction <maximumf>, %165, %cst_54 [2] : vector<1x8x8xf32> to vector<1x8xf32>
    %167 = vector.shape_cast %166 : vector<1x8xf32> to vector<1x8x1xf32>
    %168 = vector.broadcast %167 : vector<1x8x1xf32> to vector<1x8x8xf32>
    %169 = arith.subf %165, %168 : vector<1x8x8xf32>
    %170 = math.exp %169 : vector<1x8x8xf32>
    %cst_55 = arith.constant dense<0.000000e+00> : vector<1x8xf32>
    %171 = vector.multi_reduction <add>, %170, %cst_55 [2] : vector<1x8x8xf32> to vector<1x8xf32>
    %172 = vector.shape_cast %171 : vector<1x8xf32> to vector<1x8x1xf32>
    "tpu.trace_start"() <{level = 10 : i32, message = "bqk,bkd->bqd"}> : () -> ()
    %cst_56 = arith.constant dense<0.000000e+00> : vector<1x8x4xf32>
    %173 = tpu.matmul %170, %162, %cst_56 {dimension_numbers = #tpu.dot_dimension_numbers<[2], [1], [1], [2], [0, 0, 0, 1, 1, 2], [0], [0]>} : vector<1x8x8xf32>, vector<1x8x4xf32>, vector<1x8x4xf32> -> vector<1x8x4xf32>
    "tpu.trace_stop"() : () -> ()
    %174 = vector.broadcast %172 : vector<1x8x1xf32> to vector<1x8x4xf32>
    %175 = arith.divf %173, %174 : vector<1x8x4xf32>
    %176 = vector.shape_cast %175 : vector<1x8x4xf32> to vector<8x4xf32>
    %177 = vector.extract_strided_slice %18 {offsets = [28, 0], sizes = [4, 32], strides = [1, 1]} : vector<32x32xf32> to vector<4x32xf32>
    %cst_57 = arith.constant dense<0.000000e+00> : vector<8x32xf32>
    %178 = tpu.matmul %176, %177, %cst_57 {dimension_numbers = #tpu.dot_dimension_numbers<[1], [0], [0], [1], [0, 0, 1, 1], [], []>} : vector<8x4xf32>, vector<4x32xf32>, vector<8x32xf32> -> vector<8x32xf32>
    %179 = arith.addf %159, %178 : vector<8x32xf32>
    %c0_58 = arith.constant 0 : index
    %c0_59 = arith.constant 0 : index
    %180 = vector.load %arg5[%c0_58, %c0_59] : memref<1x32xf32, #tpu.memory_space<vmem>>, vector<1x32xf32>
    %181 = vector.broadcast %180 : vector<1x32xf32> to vector<8x32xf32>
    %182 = arith.addf %179, %181 : vector<8x32xf32>
    %183 = vector.shape_cast %182 : vector<8x32xf32> to vector<1x8x32xf32>
    %c0_60 = arith.constant 0 : index
    %c0_61 = arith.constant 0 : index
    %c0_62 = arith.constant 0 : index
    %184 = vector.load %arg6[%c0_60, %c0_61, %c0_62] : memref<1x8x32xf32, #tpu.memory_space<vmem>>, vector<1x8x32xf32>
    tpu.vector_store %arg6[%c0_60, %c0_61, %c0_62], %183 {strides = array<i32>} : memref<1x8x32xf32, #tpu.memory_space<vmem>>, vector<1x8x32xf32>,
    return
  }
  func.func @transform_0(%arg0: i32) -> (i32, i32, i32) {
    %c0_i32 = arith.constant 0 : i32
    %c0_i32_0 = arith.constant 0 : i32
    %c0_i32_1 = arith.constant 0 : i32
    return %arg0, %c0_i32, %c0_i32_0 : i32, i32, i32
  }
  func.func @transform_1(%arg0: i32) -> (i32, i32) {
    %c0_i32 = arith.constant 0 : i32
    %c0_i32_0 = arith.constant 0 : i32
    %c0_i32_1 = arith.constant 0 : i32
    return %c0_i32, %c0_i32_0 : i32, i32
  }
  func.func @transform_2(%arg0: i32) -> (i32, i32) {
    %c0_i32 = arith.constant 0 : i32
    %c0_i32_0 = arith.constant 0 : i32
    %c0_i32_1 = arith.constant 0 : i32
    return %c0_i32, %c0_i32_0 : i32, i32
  }
  func.func @transform_3(%arg0: i32) -> (i32, i32) {
    %c0_i32 = arith.constant 0 : i32
    %c0_i32_0 = arith.constant 0 : i32
    %c0_i32_1 = arith.constant 0 : i32
    return %c0_i32, %c0_i32_0 : i32, i32
  }
  func.func @transform_4(%arg0: i32) -> (i32, i32) {
    %c0_i32 = arith.constant 0 : i32
    %c0_i32_0 = arith.constant 0 : i32
    %c0_i32_1 = arith.constant 0 : i32
    return %c0_i32, %c0_i32_0 : i32, i32
  }
  func.func @transform_5(%arg0: i32) -> (i32, i32, i32) {
    %c0_i32 = arith.constant 0 : i32
    %c0_i32_0 = arith.constant 0 : i32
    %c0_i32_1 = arith.constant 0 : i32
    return %arg0, %c0_i32, %c0_i32_0 : i32, i32, i32
  }
}

</mosaic_0001>

<bundles_post_ra>
// kernel: tpu_custom_call.1
= control target key start
LH: loop header
LB: loop body
LE: loop exit
PB: predicated region body
PF: predicated region fallthrough
CT: control target
= control target key end

     0   :  { %10 = vsyncpa [#allocation3], 0  ;;  %s1965_s0 = inlined_call_operand.hbm [shape: f32[2,8,32], index: 0, kind: input, shape index: {}]   ;;  %s1966_s1 = inlined_call_operand.hbm [shape: f32[32,96], index: 1, kind: input, shape index: {}]   ;;  %s1967_s2 = inlined_call_operand.vmem [shape: f32[1,96], index: 2, kind: input, shape index: {}]   ;;  %s1968_s3 = inlined_call_operand.hbm [shape: f32[32,32], index: 3, kind: input, shape index: {}]   ;;  %s1969_s4 = inlined_call_operand.vmem [shape: f32[1,32], index: 4, kind: input, shape index: {}]   ;;  %s1970_s5 = inlined_call_operand.hbm [shape: f32[2,8,32], index: 5, kind: output, shape index: {}]  }
   0x1   :  { %12 = vsyncpa [#allocation3 + $0x1], 0 }
   0x2   :  { %13 = vsyncpa [#allocation6], 0 }
   0x3   :  { %14 = vsyncpa [#allocation4], 0 }
   0x4   :  { %16 = vsyncpa [#allocation4 + $0x1], 0  ;;  %s1680_s18 = smov 0   ;;  %s1682_s19 = smov 0  }
   0x5   :  { %s1684_s20 = smov 0   ;;  %s1686_s21 = smov 0  }
   0x6 LB: > { %s174_s24 = sshll.u32 %s1966_s1, 4  ;;  %s1704_s25 = sadd.s32 4294967295, %s1621_s21   ;;  %s1621_s21 = sphi %s1686_s21, %s1983_s21   ;;  %s1617_s20 = sphi %s1684_s20, %s1982_s20   ;;  %s1613_s19 = sphi %s1682_s19, %s1981_s19   ;;  %s1609_s18 = sphi %s1680_s18, %s1980_s18   ;;  %s175_s24 = int_to_ptr.hbm [resolvable:$true] %s174_s24 }
   0x7   : > { %p1279_p0 = scmp.ge.s32.totalorder %s1621_s21, 1  ;;  %p43_p1 = scmp.eq.s32.totalorder %s1704_s25, 0 }
   0x8   : > { %p163_p2 = scmp.lt.s32.totalorder %s1621_s21, 3  ;;  %s1623_s27 = smov [#allocation5]  }
   0x9   : > { %s176_s28 = sshll.u32 %s1623_s27, 4  ;;  %s191_s6 = sshll.u32 %s1968_s3, 4  ;;  %s177_s28 = int_to_ptr.vmem [resolvable:$true] %s176_s28  ;;  %s192_s6 = int_to_ptr.hbm [resolvable:$true] %s191_s6 }
   0xa   : > { %p1709_p3 = pnand %p1279_p0, %p163_p2  ;;  %s1624_s7 = smov [#allocation7]  }
   0xb   : > { %s193_s8 = sshll.u32 %s1624_s7, 4  ;;  %s1625_s9 = smov 128   ;;  %s194_s8 = int_to_ptr.vmem [resolvable:$true] %s193_s8 }
   0xc   : > { %p1347_p4 = pneg %p1709_p3  ;;  %s1626_s10 = smov 8  }
   0xd   : > { %s1278_s11 = sadd.s32 4294967294, %s1621_s21   ;;  %s1723_s12 = sadd.s32 1, %s1621_s21  }
   0xe   : > { %p1348_p6 = pnand %p1347_p4, %p43_p1  ;;  %s26_s13 = ssub.s32 %s1621_s21, %s1723_s12 }
   0xf   : > { %s29_s14 = sadd.s32 1, %s1617_s20  ;;  %p27_p7 = scmp.eq.s32.totalorder %s26_s13, 0 }
  0x10   : > { %1350 = dma.hbm_to_vmem [thread:$0]  (!%p1348_p6), %s175_s24, 512, %s177_s28, [#allocation6], %s1625_s9, %s1625_s9, %s1626_s10  }
  0x11   : > { %1353 = dma.hbm_to_vmem [thread:$0]  (!%p1348_p6), %s192_s6, 512, %s194_s8, [#allocation6], %s1625_s9, %s1625_s9, %s1626_s10  }
  0x12   : > { %p36_p8 = scmp.ne.s32.totalorder %s1617_s20, %s1613_s19  ;;  %p37_p9 = scmp.eq.s32.totalorder %s1621_s21, 0 }
  0x13   : > { %p42_p10 = scmp.ne.s32.totalorder %s1613_s19, %s1609_s18  ;;  %p150_p13 = scmp.eq.s32.totalorder %s1704_s25, 1 }
  0x14   : > { %s1734_s15 = scalar_select %p27_p7, %s1617_s20, %s29_s14  }
  0x15   : > { %p1736_p11 = por %p37_p9, %p36_p8  ;;  %p1742_p12 = por %p43_p1, %p42_p10 }
  0x16   : > { %p156_p0 = scmp.eq.s32.totalorder %s1278_s11, 1  ;;  %p1364_p2 = scmp.lt.s32.totalorder %s1621_s21, 2 }
  0x17   : > { %s210_s22 = sand.u32 1, %s1617_s20   ;;  %p1749_p4 = por %p150_p13, %p36_p8 }
  0x18   : > { %p1753_p6 = por %p156_p0, %p42_p10  ;;  %s1283_s27 = sshll.u32 %s210_s22, 3 }
  0x19   : > { %s1284_s28 = sshll.u32 %s1621_s21, 3  ;;  %s214_s7 = scalar_lea.vmem [#allocation2], %s1283_s27 }
  0x1a   : > { %s218_s6 = scalar_lea.hbm %s1965_s0, %s1284_s28  ;;  %s222_s8 = sshll.u32 %s214_s7, 4  ;;  %s223_s8 = int_to_ptr.vmem [resolvable:$true] %s222_s8 }
  0x1b   : > { %s220_s9 = sshll.u32 %s218_s6, 4  ;;  %p1763_p7 = pnand %p1364_p2, %p1736_p11  ;;  %s221_s9 = int_to_ptr.hbm [resolvable:$true] %s220_s9 }
  0x1c   : > { %s211_s11 = scalar_lea.sflag [#allocation3], %s210_s22  ;;  %s1521_s13 = sshra.s32 %s221_s9, 4  ;;  %s1522_s13 = int_to_ptr.hbm [resolvable:$true] %s1521_s13 }
  0x1d   : > { %s1523_s14 = scalar_lea.hbm %s1522_s13, 8  ;;  %p1525_p9 = pneg %p1763_p7 }
  0x1e   : > { %p1524_p8 = scmp.ne.s32.totalorder %s1522_s13, %s1523_s14  ;;  %s1528_s29 = scalar_lea.hbm %s1965_s0, 16 }
  0x1f   : > { %p1529_p11 = scmp.lt.s32.totalorder %s1522_s13, %s1965_s0  ;;  %p1530_p0 = scmp.lt.s32.totalorder %s1528_s29, %s1523_s14 }
  0x20   : > { %p1526_p10 = pnand %p1525_p9, %p1524_p8 }
  0x21   : > { %p1531_p2 = por %p1530_p0, %p1529_p11 }
  0x22   : > { %p1527_p13 = pneg %p1526_p10 }
  0x24   : > { %p1532_p5 = pnand %p1531_p2, %p1527_p13 }
  0x26   : > { %1535 = shalt.err (!%p1532_p5)
}
  0x27   : > { %1357 = dma.hbm_to_vmem [thread:$0]  (!%p1763_p7), %s221_s9, 128, %s223_s8, %s211_s11  }
  0x28   : > { %231 = sbr.rel (%p1709_p3) target bundleno = 2048 (0x800), region = 40  ;;  %s1780_s22 = sand.u32 (!%p1709_p3), 1, %s1613_s19  }
  0x29   : > { %s1286_s6 = sshll.u32 (!%p1709_p3), %s1780_s22, 3  ;;  %s234_s7 = scalar_lea.sflag (!%p1709_p3), [#allocation3], %s1780_s22 }
  0x2a   : > { %s237_s13 = scalar_lea.vmem (!%p1709_p3), [#allocation2], %s1286_s6 }
  0x2d   : > { %1596 = dma.done.wait (%p1742_p12), %s234_s7, 128  }
  0x2e   : > { %1598 = vsyncadd (%p1742_p12), %s234_s7, 4294967168 }
  0x2f   : > { %1600 = dma.done.wait (%p43_p1), [#allocation6], 1024  }
  0x30   : > { %1602 = vsyncadd (%p43_p1), [#allocation6], 4294966272  ;;  %v279_v0 = vld [vmem:[#allocation5 + $0x18] sm:$0xff]  ;;  %v278_v1 = vld [vmem:[#allocation5 + $0x10] sm:$0xff]  ;;  %vm284_vm0 = vcmask 261120   ;;  %s1627_s8 = smov 92   ;;  %v309_v19 = vlaneseq }
  0x31   : > { %300 = vmatpush.msra.mxu0 %v279_v0  ;;  %v277_v2 = vld [vmem:[#allocation5 + $0x8] sm:$0xff]  ;;  %v276_v3 = vld [vmem:[#allocation5] sm:$0xff]  ;;  %v275_v4 = vld [vmem:[%s237_s13] sm:$0xff]  ;;  %s1628_s9 = smov 64   ;;  %s1629_s10 = smov 96   ;;  %vm321_vm1 = vcmask 31744  }
  0x32   : > { %v1427_v5 = vld [vmem:[%s1967_s2] ss:$0 sm:$0xff]  ;;  %s1630_s11 = smov 124   ;;  %s1631_s14 = smov 84   ;;  %v314_v9 = vld [vmem:[#allocation7] sm:$0xff]  ;;  %vm483_vm2 = vcmask 1043456  }
  0x33   : > { %301 = vmatpush.msra.mxu0 %v278_v1  ;;  %s1632_s27 = smov 116   ;;  %s1633_s28 = smov 88   ;;  %v479_v13 = vrot.slane %v314_v9, 4  ;;  %v310_v20 = vshrl.u32 %v309_v19, 7  ;;  %v312_v21 = vand.u32 127, %v309_v19  ;;  %vm348_vm4 = vcmask 64512  }
  0x34   : > { %s1634_s29 = smov 120   ;;  %s1635_s30 = smov 60  }
  0x35   : > { %302 = vmatpush.msra.mxu0 %v277_v2  ;;  %vm1823_vm3 = vcmp.ge.s32.totalorder %v310_v20, %v312_v21  ;;  %s1636_s16 = smov 52   ;;  %s1637_s7 = smov 76   ;;  %v315_v2 = vld [vmem:[#allocation7 + $0x8] sm:$0xff] }
  0x36   : > { %s1638_s13 = smov 108   ;;  %s1639_s26 = smov 56  }
  0x37   : > { %303 = vmatpush.msra.mxu0 %v276_v3  ;;  %s1640_s17 = smov 80  }
  0x38   : > { %1290 = vmatmul.msk.f32.vlgmr.msra.gmra.mxu0 %vm284_vm0, %v275_v4 }
  0xb5   : > { %v305_v6 = vpop.f32.mrf.mxu0 }
  0xb6   : > { %v1798_v7 = vadd.f32 %v1427_v5, %v305_v6 }
  0xb8   : > { %401 = vrot.lane.b32.xlu2 %v1798_v7, %s1627_s8  ;;  %358 = vrot.lane.b32.xlu1 %v1798_v7, %s1628_s9  ;;  %v1804_v8 = vmul.f32 0.5, %v1798_v7  ;;  %s1641_s8 = smov 48   ;;  %s1642_s9 = smov 44  }
  0xb9   : > { %319 = vrot.lane.b32.xlu0 %v1798_v7, %s1629_s10  ;;  %s1643_s10 = smov 112  }
  0xc0   : > { %399 = vrot.lane.b32.xlu2 %v1804_v8, %s1630_s11  ;;  %s1644_s11 = smov 100  }
  0xc8   : > { %639 = vrot.lane.b32.xlu2 %v1798_v7, %s1631_s14  ;;  %s1645_s14 = smov 104  }
  0xd0   : > { %637 = vrot.lane.b32.xlu2 %v1804_v8, %s1632_s27  ;;  %s1646_s27 = smov 68  }
  0xd8   : > { %533 = vrot.lane.b32.xlu2 %v1798_v7, %s1633_s28  ;;  %s1647_s28 = smov 40  }
  0xe0   : > { %531 = vrot.lane.b32.xlu2 %v1804_v8, %s1634_s29  ;;  %s1648_s29 = smov 72  }
 0x112   : > { %v402_v10 = vpop.permute.xlu2 %401 }
 0x113   : > { %1294 = vmatpush.xpose.msk.msra.mxu3 %vm321_vm1, %v402_v10 }
 0x117   : > { %1299 = vmatpush.msk.msrb.mxu3 %vm483_vm2, %v314_v9 }
 0x11a   : > { %v400_v11 = vpop.permute.xlu2 %399 }
 0x11b   : > { %1295 = vmatmul.msk.f32.vlgmr.msra.gmra.mxu3 %vm321_vm1, %v400_v11  ;;  %v716_v11 = vrot.slane %v315_v2, 4 }
 0x122   : > { %v640_v12 = vpop.permute.xlu2 %639 }
 0x123   : > { %1306 = vmatpush.xpose.msk.msra.mxu3 %vm321_vm1, %v640_v12 }
 0x12a   : > { %v359_v14 = vpop.permute.xlu1 %358  ;;  %v1815_v15 = vpop.permute.xlu2 %637 }
 0x12b   : > { %v320_v16 = vpop.permute.xlu0 %319  ;;  %379 = vmatpush.msra.mxu2 %v359_v14 }
 0x12c   : > { %1291 = vmatpush.xpose.msk.msra.mxu1 %vm321_vm1, %v320_v16 }
 0x12f   : > { %1292 = vmatmul.msk.f32.vlgmr.msra.gmra.mxu1 %vm321_vm1, %v1804_v8 }
 0x130   : > { %1297 = vmatpush.msk.msrb.mxu1 %vm483_vm2, %v479_v13 }
 0x132   : > { %v534_v17 = vpop.permute.xlu2 %533  ;;  %1304 = vmatpush.msk.msra.mxu1 %vm483_vm2, %v315_v2 }
 0x133   : > { %1301 = vmatpush.xpose.msk.msrb.mxu0 %vm321_vm1, %v534_v17 }
 0x13a   : > { %v532_v18 = vpop.permute.xlu2 %531 }
 0x13b   : > { %1302 = vmatmul.msk.f32.vlgmr.msrb.gmra.mxu0 %vm321_vm1, %v532_v18 }
 0x19e   : > { %v424_v23 = vpop.f32.mrf.mxu3 }
 0x19f   : > { %v427_v24 = vsel %vm1823_vm3, %v424_v23, -inf }
 0x1a0   : > { %v428_v25 = vsel %vm348_vm4, %v427_v24, -inf }
 0x1a1   : > { %429 = vmax.xlane.f32.xlu2 %v428_v25 }
 0x1ac   : > { %v344_v26 = vpop.f32.mrf.mxu1 }
 0x1ad   : > { %v347_v27 = vsel %vm1823_vm3, %v344_v26, -inf }
 0x1ae   : > { %v349_v28 = vsel %vm348_vm4, %v347_v27, -inf }
 0x1af   : > { %350 = vmax.xlane.f32.xlu0 %v349_v28 }
 0x1b8   : > { %v556_v29 = vpop.f32.mrf.mxu0 }
 0x1b9   : > { %v559_v30 = vsel %vm1823_vm3, %v556_v29, -inf }
 0x1ba   : > { %v560_v31 = vsel %vm348_vm4, %v559_v30, -inf }
 0x1bb   : > { %561 = vmax.xlane.f32.xlu0 %v560_v31 }
 0x1cf   : > { %437 = vrot.lane.b32.xlu0 %v1798_v7, %s1635_s30  ;;  %s1649_s30 = smov 36  }
 0x1d7   : > { %675 = vrot.lane.b32.xlu0 %v1798_v7, %s1636_s16  ;;  %s1332_s16 = sshll.u32 %s1704_s25, 3  ;;  %s1174_s25 = scalar_lea.sflag [#allocation4], %s1780_s22 }
 0x214   : > { %v430_v39 = vpop.xlane.xlu2 %429 }
 0x215   : > { %v431_v41 = vsub.f32 %v427_v24, %v430_v39 }
 0x217   : > { %v432_v42 = vmul.f32 1.442695, %v431_v41 }
 0x222   : > { %v351_v32 = vpop.xlane.xlu0 %350 }
 0x223   : > { %v352_v33 = vsub.f32 %v347_v27, %v351_v32 }
 0x225   : > { %v353_v34 = vmul.f32 1.442695, %v352_v33 }
 0x227   : > { %1429 = vpow2.f32 %v353_v34 }
 0x22d   : > { %v1430_v35 = vpop.eup %1429 }
 0x22e   : > { %1293 = vmatmul.msk.f32.vlgmr.msra.gmra.mxu2 %vm348_vm4, %v1430_v35  ;;  %v355_v36 = vsel %vm348_vm4, %v1430_v35, 0.0  ;;  %v562_v37 = vpop.xlane.xlu0 %561 }
 0x22f   : > { %356 = vadd.xlane.f32.xlu1 %v355_v36  ;;  %v563_v38 = vsub.f32 %v559_v30, %v562_v37 }
 0x231   : > { %v564_v40 = vmul.f32 1.442695, %v563_v38 }
 0x233   : > { %1431 = vpow2.f32 %v564_v40 }
 0x234   : > { %1433 = vpow2.f32 %v432_v42 }
 0x239   : > { %v1840_v43 = vpop.eup %1431 }
 0x23a   : > { %v566_v44 = vsel %vm348_vm4, %v1840_v43, 0.0  ;;  %v1434_v46 = vpop.eup %1433 }
 0x23b   : > { %567 = vadd.xlane.f32.xlu2 %v566_v44  ;;  %v434_v1 = vsel %vm348_vm4, %v1434_v46, 0.0 }
 0x241   : > { %v438_v45 = vpop.permute.xlu0 %437 }
 0x242   : > { %458 = vmatpush.msrb.mxu2 %v438_v45 }
 0x243   : > { %1296 = vmatmul.msk.f32.vlgmr.msrb.gmra.mxu2 %vm348_vm4, %v1434_v46 }
 0x249   : > { %v676_v47 = vpop.permute.xlu0 %675 }
 0x24a   : > { %696 = vmatpush.msra.mxu0 %v676_v47 }
 0x253   : > { %851 = vrot.lane.b32.xlu2 %v1798_v7, %s1637_s7 }
 0x25b   : > { %849 = vrot.lane.b32.xlu2 %v1804_v8, %s1638_s13 }
 0x2a2   : > { %v357_v48 = vpop.xlane.xlu1 %356 }
 0x2a3   : > { %1435 = vrcp.f32 %v357_v48  ;;  %v395_v52 = vand.u32 2147483648, %v357_v48  ;;  %v393_v54 = vand.u32 2147483647, %v357_v48  ;;  %vm389_vm6 = vweird.f32 %v357_v48 }
 0x2a5   : > { %v396_v56 = vor.u32 1.1754944e-38, %v395_v52  ;;  %vm394_vm8 = vcmp.eq.f32.partialorder %v393_v54, 8.507059e+37 }
 0x2a9   : > { %v1436_v49 = vpop.eup %1435 }
 0x2aa   : > { %v385_v50 = vmul.f32 %v1436_v49, %v357_v48  ;;  %vm390_vm5 = vweird.f32 %v1436_v49 }
 0x2ab   : > { %vm391_vm7 = vmor %vm389_vm6, %vm390_vm5 }
 0x2ac   : > { %v386_v51 = vsub.f32 1.0, %v385_v50 }
 0x2ae   : > { %v387_v53 = vmul.f32 %v1436_v49, %v386_v51  ;;  %v1863_v10 = vpop.xlane.xlu2 %567 }
 0x2af   : > { %v606_v48 = vand.u32 2147483648, %v1863_v10 }
 0x2b0   : > { %v388_v55 = vadd.f32 %v1436_v49, %v387_v53 }
 0x2b1   : > { %v381_v58 = vpop.f32.mrf.mxu2  ;;  %v607_v52 = vor.u32 1.1754944e-38, %v606_v48 }
 0x2b2   : > { %v392_v57 = vsel %vm391_vm7, %v1436_v49, %v388_v55  ;;  %vm600_vm7 = vweird.f32 %v1863_v10  ;;  %v604_v49 = vand.u32 2147483647, %v1863_v10 }
 0x2b3   : > { %v397_v59 = vsel %vm394_vm8, %v396_v56, %v392_v57 }
 0x2b4   : > { %v398_v60 = vmul.f32 %v397_v59, %v381_v58 }
 0x2b6   : > { %1300 = vmatmul.msk.f32.vlgmr.msrb.gmra.mxu3 %vm321_vm1, %v398_v60  ;;  %v852_v13 = vpop.permute.xlu2 %851 }
 0x2be   : > { %1307 = vmatmul.msk.f32.vlgmr.msra.gmra.mxu3 %vm321_vm1, %v1815_v15  ;;  %v850_v51 = vpop.permute.xlu2 %849 }
 0x2c6   : > { %v460_v25 = vpop.f32.mrf.mxu2 }
 0x339   : > { %v1850_v61 = vpop.f32.mrf.mxu3 }
 0x341   : > { %v662_v62 = vpop.f32.mrf.mxu3 }
 0x342   : > { %v665_v63 = vsel %vm1823_vm3, %v662_v62, -inf }
 0x343   : > { %v666_v0 = vsel %vm348_vm4, %v665_v63, -inf }
 0x344   : > { %667 = vmax.xlane.f32.xlu1 %v666_v0 }
 0x35d   : > { %569 = vrot.lane.b32.xlu1 %v1798_v7, %s1639_s26  ;;  %s1184_s26 = scalar_lea.hbm %s1970_s5, %s1332_s16 }
 0x387   : > { %435 = vadd.xlane.f32.xlu1 %v434_v1 }
 0x3a0   : > { %745 = vrot.lane.b32.xlu1 %v1798_v7, %s1640_s17 }
 0x3a8   : > { %781 = vrot.lane.b32.xlu1 %v1798_v7, %s1641_s8 }
 0x3b0   : > { %887 = vrot.lane.b32.xlu1 %v1798_v7, %s1642_s9  ;;  %s274_s9 = scalar_lea.vmem [#allocation8], %s1286_s6  ;;  %s1571_s6 = scalar_lea.hbm %s1970_s5, 16 }
 0x3b7   : > { %v668_v3 = vpop.xlane.xlu1 %667 }
 0x3b8   : > { %v669_v4 = vsub.f32 %v665_v63, %v668_v3 }
 0x3ba   : > { %v670_v5 = vmul.f32 1.442695, %v669_v4 }
 0x3bc   : > { %1437 = vpow2.f32 %v670_v5 }
 0x3c2   : > { %v1438_v6 = vpop.eup %1437 }
 0x3c3   : > { %1308 = vmatmul.msk.f32.vlgmr.msra.gmra.mxu0 %vm348_vm4, %v1438_v6  ;;  %v672_v9 = vsel %vm348_vm4, %v1438_v6, 0.0 }
 0x3c4   : > { %673 = vadd.xlane.f32.xlu0 %v672_v9 }
 0x3cf   : > { %v570_v12 = vpop.permute.xlu1 %569 }
 0x3d0   : > { %590 = vmatpush.msra.mxu2 %v570_v12 }
 0x3d1   : > { %1303 = vmatmul.msk.f32.vlgmr.msra.gmra.mxu2 %vm348_vm4, %v1840_v43 }
 0x3d2   : > { %1309 = vmatpush.msk.msrb.mxu2 %vm483_vm2, %v716_v11 }
 0x3d4   : > { %1316 = vmatpush.xpose.msk.msra.mxu2 %vm321_vm1, %v852_v13 }
 0x3d8   : > { %743 = vrot.lane.b32.xlu0 %v1804_v8, %s1643_s10  ;;  %s1186_s10 = sshll.u32 %s274_s9, 4  ;;  %s1187_s10 = int_to_ptr.vmem [resolvable:$true] %s1186_s10 }
 0x3fa   : > { %v436_v14 = vpop.xlane.xlu1 %435 }
 0x3fb   : > { %1439 = vrcp.f32 %v436_v14  ;;  %v474_v18 = vand.u32 2147483648, %v436_v14  ;;  %v472_v20 = vand.u32 2147483647, %v436_v14  ;;  %vm468_vm10 = vweird.f32 %v436_v14 }
 0x3fc   : > { %1441 = vrcp.f32 %v1863_v10 }
 0x3fd   : > { %v475_v23 = vor.u32 1.1754944e-38, %v474_v18  ;;  %vm473_vm12 = vcmp.eq.f32.partialorder %v472_v20, 8.507059e+37  ;;  %v316_v18 = vld [vmem:[#allocation7 + $0x10] sm:$0xff] }
 0x3fe   : > { %1314 = vmatpush.msk.msrb.mxu0 %vm483_vm2, %v316_v18 }
 0x401   : > { %v1440_v15 = vpop.eup %1439 }
 0x402   : > { %v464_v16 = vmul.f32 %v1440_v15, %v436_v14  ;;  %vm469_vm9 = vweird.f32 %v1440_v15  ;;  %v1442_v31 = vpop.eup %1441 }
 0x403   : > { %vm470_vm11 = vmor %vm468_vm10, %vm469_vm9  ;;  %v596_v34 = vmul.f32 %v1442_v31, %v1863_v10  ;;  %vm601_vm6 = vweird.f32 %v1442_v31  ;;  %vm605_vm9 = vcmp.eq.f32.partialorder %v604_v49, 8.507059e+37 }
 0x404   : > { %v465_v17 = vsub.f32 1.0, %v464_v16  ;;  %vm602_vm8 = vmor %vm600_vm7, %vm601_vm6 }
 0x405   : > { %v597_v39 = vsub.f32 1.0, %v596_v34 }
 0x406   : > { %v466_v19 = vmul.f32 %v1440_v15, %v465_v17 }
 0x407   : > { %v598_v46 = vmul.f32 %v1442_v31, %v597_v39 }
 0x408   : > { %v467_v21 = vadd.f32 %v1440_v15, %v466_v19  ;;  %v928_v19 = vrot.slane %v316_v18, 4 }
 0x409   : > { %v599_v47 = vadd.f32 %v1442_v31, %v598_v46 }
 0x40a   : > { %v471_v24 = vsel %vm470_vm11, %v1440_v15, %v467_v21 }
 0x40b   : > { %v476_v26 = vsel %vm473_vm12, %v475_v23, %v471_v24  ;;  %v603_v50 = vsel %vm602_vm8, %v1442_v31, %v599_v47 }
 0x40c   : > { %v477_v27 = vmul.f32 %v476_v26, %v460_v25  ;;  %v608_v54 = vsel %vm605_vm9, %v607_v52, %v603_v50 }
 0x40e   : > { %1298 = vmatmul.msk.f32.vlgmr.msrb.gmra.mxu1 %vm321_vm1, %v477_v27 }
 0x412   : > { %v746_v28 = vpop.permute.xlu1 %745 }
 0x413   : > { %1311 = vmatpush.xpose.msk.msrb.mxu1 %vm321_vm1, %v746_v28 }
 0x41a   : > { %v782_v29 = vpop.permute.xlu1 %781 }
 0x41b   : > { %802 = vmatpush.msrb.mxu3 %v782_v29 }
 0x41d   : > { %1319 = vmatpush.msk.msra.mxu3 %vm483_vm2, %v928_v19 }
 0x422   : > { %v888_v56 = vpop.permute.xlu1 %887 }
 0x437   : > { %v674_v30 = vpop.xlane.xlu0 %673 }
 0x438   : > { %1443 = vrcp.f32 %v674_v30  ;;  %v712_v36 = vand.u32 2147483648, %v674_v30  ;;  %v710_v38 = vand.u32 2147483647, %v674_v30  ;;  %vm706_vm14 = vweird.f32 %v674_v30 }
 0x43a   : > { %v713_v41 = vor.u32 1.1754944e-38, %v712_v36  ;;  %vm711_vm5 = vcmp.eq.f32.partialorder %v710_v38, 8.507059e+37 }
 0x43e   : > { %v1444_v32 = vpop.eup %1443 }
 0x43f   : > { %v702_v33 = vmul.f32 %v1444_v32, %v674_v30  ;;  %vm707_vm13 = vweird.f32 %v1444_v32 }
 0x440   : > { %vm708_vm15 = vmor %vm706_vm14, %vm707_vm13  ;;  %v698_v43 = vpop.f32.mrf.mxu0 }
 0x441   : > { %v703_v35 = vsub.f32 1.0, %v702_v33 }
 0x443   : > { %v704_v37 = vmul.f32 %v1444_v32, %v703_v35 }
 0x445   : > { %v705_v40 = vadd.f32 %v1444_v32, %v704_v37 }
 0x447   : > { %v709_v42 = vsel %vm708_vm15, %v1444_v32, %v705_v40 }
 0x448   : > { %v714_v44 = vsel %vm711_vm5, %v713_v41, %v709_v42 }
 0x449   : > { %v715_v45 = vmul.f32 %v714_v44, %v698_v43 }
 0x44a   : > { %v744_v57 = vpop.permute.xlu0 %743 }
 0x44b   : > { %1310 = vmatmul.msk.f32.vlgmr.msrb.gmra.mxu2 %vm321_vm1, %v715_v45 }
 0x453   : > { %1317 = vmatmul.msk.f32.vlgmr.msra.gmra.mxu2 %vm321_vm1, %v850_v51 }
 0x454   : > { %v592_v53 = vpop.f32.mrf.mxu2 }
 0x455   : > { %v609_v55 = vmul.f32 %v608_v54, %v592_v53 }
 0x457   : > { %1305 = vmatmul.msk.f32.vlgmr.msra.gmra.mxu1 %vm321_vm1, %v609_v55 }
 0x458   : > { %908 = vmatpush.msra.mxu1 %v888_v56 }
 0x45f   : > { %1312 = vmatmul.msk.f32.vlgmr.msrb.gmra.mxu1 %vm321_vm1, %v744_v57 }
 0x48b   : > { %v503_v58 = vpop.f32.mrf.mxu1 }
 0x48c   : > { %v529_v60 = vadd.f32 %v1850_v61, %v503_v58 }
 0x4ce   : > { %v739_v59 = vpop.f32.mrf.mxu2 }
 0x4d4   : > { %v633_v62 = vpop.f32.mrf.mxu1 }
 0x4d5   : > { %v636_v63 = vadd.f32 %v633_v62, %v529_v60 }
 0x4d6   : > { %v874_v0 = vpop.f32.mrf.mxu2 }
 0x4d7   : > { %v877_v1 = vsel %vm1823_vm3, %v874_v0, -inf  ;;  %v1884_v2 = vadd.f32 %v739_v59, %v636_v63 }
 0x4d8   : > { %v878_v3 = vsel %vm348_vm4, %v877_v1, -inf }
 0x4d9   : > { %879 = vmax.xlane.f32.xlu0 %v878_v3 }
 0x4dc   : > { %v768_v4 = vpop.f32.mrf.mxu1 }
 0x4dd   : > { %v771_v5 = vsel %vm1823_vm3, %v768_v4, -inf }
 0x4de   : > { %v772_v6 = vsel %vm348_vm4, %v771_v5, -inf }
 0x4df   : > { %773 = vmax.xlane.f32.xlu2 %v772_v6 }
 0x4ed   : > { %1061 = vrot.lane.b32.xlu0 %v1804_v8, %s1644_s11  ;;  %s1188_s11 = sshll.u32 %s1184_s26, 4  ;;  %s1189_s11 = int_to_ptr.hbm [resolvable:$true] %s1188_s11 }
 0x54c   : > { %v880_v61 = vpop.xlane.xlu0 %879 }
 0x54d   : > { %v881_v9 = vsub.f32 %v877_v1, %v880_v61  ;;  %v317_v61 = vld [vmem:[#allocation7 + $0x18] sm:$0xff] }
 0x54e   : > { %1324 = vmatpush.msk.msrb.mxu1 %vm483_vm2, %v317_v61 }
 0x54f   : > { %v882_v10 = vmul.f32 1.442695, %v881_v9  ;;  %v1140_v9 = vrot.slane %v317_v61, 4 }
 0x551   : > { %1445 = vpow2.f32 %v882_v10 }
 0x552   : > { %v774_v11 = vpop.xlane.xlu2 %773 }
 0x553   : > { %v775_v12 = vsub.f32 %v771_v5, %v774_v11 }
 0x555   : > { %v776_v13 = vmul.f32 1.442695, %v775_v12 }
 0x557   : > { %v1446_v14 = vpop.eup %1445  ;;  %1447 = vpow2.f32 %v776_v13 }
 0x558   : > { %1318 = vmatmul.msk.f32.vlgmr.msra.gmra.mxu1 %vm348_vm4, %v1446_v14  ;;  %v884_v15 = vsel %vm348_vm4, %v1446_v14, 0.0 }
 0x559   : > { %885 = vadd.xlane.f32.xlu1 %v884_v15 }
 0x55d   : > { %v1448_v16 = vpop.eup %1447 }
 0x55e   : > { %1313 = vmatmul.msk.f32.vlgmr.msrb.gmra.mxu3 %vm348_vm4, %v1448_v16  ;;  %v778_v17 = vsel %vm348_vm4, %v1448_v16, 0.0 }
 0x55f   : > { %779 = vadd.xlane.f32.xlu2 %v778_v17  ;;  %v1062_v48 = vpop.permute.xlu0 %1061 }
 0x572   : > { %955 = vrot.lane.b32.xlu1 %v1804_v8, %s1645_s14  ;;  %s1565_s14 = sshra.s32 %s1189_s11, 4  ;;  %s1566_s14 = int_to_ptr.hbm [resolvable:$true] %s1565_s14 }
 0x573   : > { %p1572_p12 = scmp.lt.s32.totalorder %s1566_s14, %s1970_s5 }
 0x577   : > { %1063 = vrot.lane.b32.xlu2 %v1798_v7, %s1646_s27  ;;  %s1567_s27 = scalar_lea.hbm %s1566_s14, 8 }
 0x578   : > { %p1568_p1 = scmp.ne.s32.totalorder %s1566_s14, %s1567_s27  ;;  %p1573_p7 = scmp.lt.s32.totalorder %s1571_s6, %s1567_s27 }
 0x57a   : > { %993 = vrot.lane.b32.xlu1 %v1798_v7, %s1647_s28  ;;  %p1569_p3 = pnand %p1568_p1, %p1749_p4  ;;  %p1574_p8 = por %p1573_p7, %p1572_p12 }
 0x57c   : > { %p1570_p5 = pneg %p1569_p3 }
 0x57e   : > { %p1575_p9 = pnand %p1574_p8, %p1570_p5 }
 0x57f   : > { %957 = vrot.lane.b32.xlu2 %v1798_v7, %s1648_s29 }
 0x582   : > { %1099 = vrot.lane.b32.xlu1 %v1798_v7, %s1649_s30 }
 0x5cc   : > { %v886_v20 = vpop.xlane.xlu1 %885 }
 0x5cd   : > { %1449 = vrcp.f32 %v886_v20  ;;  %v924_v25 = vand.u32 2147483648, %v886_v20  ;;  %v922_v27 = vand.u32 2147483647, %v886_v20  ;;  %vm918_vm11 = vweird.f32 %v886_v20 }
 0x5cf   : > { %v925_v31 = vor.u32 1.1754944e-38, %v924_v25  ;;  %vm923_vm13 = vcmp.eq.f32.partialorder %v922_v27, 8.507059e+37 }
 0x5d2   : > { %v780_v8 = vpop.xlane.xlu2 %779 }
 0x5d3   : > { %v1450_v21 = vpop.eup %1449  ;;  %1451 = vrcp.f32 %v780_v8  ;;  %v818_v36 = vand.u32 2147483648, %v780_v8  ;;  %v816_v39 = vand.u32 2147483647, %v780_v8  ;;  %vm812_vm15 = vweird.f32 %v780_v8 }
 0x5d4   : > { %v914_v23 = vmul.f32 %v1450_v21, %v886_v20  ;;  %vm919_vm10 = vweird.f32 %v1450_v21 }
 0x5d5   : > { %vm920_vm12 = vmor %vm918_vm11, %vm919_vm10  ;;  %v910_v34 = vpop.f32.mrf.mxu1  ;;  %v819_v41 = vor.u32 1.1754944e-38, %v818_v36  ;;  %vm817_vm6 = vcmp.eq.f32.partialorder %v816_v39, 8.507059e+37 }
 0x5d6   : > { %v915_v24 = vsub.f32 1.0, %v914_v23 }
 0x5d8   : > { %v916_v26 = vmul.f32 %v1450_v21, %v915_v24 }
 0x5d9   : > { %v1452_v28 = vpop.eup %1451 }
 0x5da   : > { %v808_v29 = vmul.f32 %v1452_v28, %v780_v8  ;;  %v917_v7 = vadd.f32 %v1450_v21, %v916_v26  ;;  %v1064_v30 = vpop.permute.xlu2 %1063  ;;  %vm813_vm14 = vweird.f32 %v1452_v28 }
 0x5db   : > { %1326 = vmatpush.xpose.msk.msrb.mxu3 %vm321_vm1, %v1064_v30  ;;  %vm814_vm5 = vmor %vm812_vm15, %vm813_vm14 }
 0x5dc   : > { %v809_v32 = vsub.f32 1.0, %v808_v29  ;;  %v921_v33 = vsel %vm920_vm12, %v1450_v21, %v917_v7 }
 0x5dd   : > { %v926_v35 = vsel %vm923_vm13, %v925_v31, %v921_v33 }
 0x5de   : > { %v927_v37 = vmul.f32 %v926_v35, %v910_v34  ;;  %v810_v38 = vmul.f32 %v1452_v28, %v809_v32 }
 0x5e0   : > { %1320 = vmatmul.msk.f32.vlgmr.msra.gmra.mxu3 %vm321_vm1, %v927_v37  ;;  %v811_v40 = vadd.f32 %v1452_v28, %v810_v38  ;;  %v1428_v37 = vld [vmem:[%s1969_s4] ss:$0 sm:$0xff] }
 0x5e1   : > { %v804_v44 = vpop.f32.mrf.mxu3 }
 0x5e2   : > { %v815_v42 = vsel %vm814_vm5, %v1452_v28, %v811_v40  ;;  %v958_v43 = vpop.permute.xlu2 %957 }
 0x5e3   : > { %v820_v45 = vsel %vm817_vm6, %v819_v41, %v815_v42  ;;  %1321 = vmatpush.xpose.msk.msra.mxu0 %vm321_vm1, %v958_v43 }
 0x5e4   : > { %v821_v46 = vmul.f32 %v820_v45, %v804_v44  ;;  %v956_v47 = vpop.permute.xlu1 %955 }
 0x5e6   : > { %1315 = vmatmul.msk.f32.vlgmr.msrb.gmra.mxu0 %vm321_vm1, %v821_v46 }
 0x5e8   : > { %1327 = vmatmul.msk.f32.vlgmr.msrb.gmra.mxu3 %vm321_vm1, %v1062_v48 }
 0x5ec   : > { %v994_v49 = vpop.permute.xlu1 %993 }
 0x5ed   : > { %1014 = vmatpush.msrb.mxu2 %v994_v49 }
 0x5ee   : > { %1322 = vmatmul.msk.f32.vlgmr.msra.gmra.mxu0 %vm321_vm1, %v956_v47 }
 0x5ef   : > { %1329 = vmatpush.msk.msra.mxu2 %vm483_vm2, %v1140_v9 }
 0x5f4   : > { %v1100_v50 = vpop.permute.xlu1 %1099 }
 0x5f5   : > { %1120 = vmatpush.msrb.mxu0 %v1100_v50 }
 0x663   : > { %v845_v51 = vpop.f32.mrf.mxu0  ;;  %v951_v52 = vpop.f32.mrf.mxu3 }
 0x664   : > { %v848_v53 = vadd.f32 %v845_v51, %v1884_v2 }
 0x666   : > { %v1909_v54 = vadd.f32 %v951_v52, %v848_v53 }
 0x66b   : > { %v980_v55 = vpop.f32.mrf.mxu0  ;;  %v1086_v56 = vpop.f32.mrf.mxu3 }
 0x66c   : > { %v983_v57 = vsel %vm1823_vm3, %v980_v55, -inf  ;;  %v1089_v58 = vsel %vm1823_vm3, %v1086_v56, -inf }
 0x66d   : > { %v984_v59 = vsel %vm348_vm4, %v983_v57, -inf  ;;  %v1090_v60 = vsel %vm348_vm4, %v1089_v58, -inf }
 0x66e   : > { %985 = vmax.xlane.f32.xlu0 %v984_v59  ;;  %1091 = vmax.xlane.f32.xlu2 %v1090_v60 }
 0x6e1   : > { %v1092_v62 = vpop.xlane.xlu2 %1091  ;;  %v986_v63 = vpop.xlane.xlu0 %985 }
 0x6e2   : > { %v1093_v0 = vsub.f32 %v1089_v58, %v1092_v62  ;;  %v987_v1 = vsub.f32 %v983_v57, %v986_v63 }
 0x6e4   : > { %v1094_v2 = vmul.f32 1.442695, %v1093_v0  ;;  %v988_v3 = vmul.f32 1.442695, %v987_v1 }
 0x6e6   : > { %1453 = vpow2.f32 %v1094_v2 }
 0x6e7   : > { %1455 = vpow2.f32 %v988_v3 }
 0x6ec   : > { %v1454_v4 = vpop.eup %1453 }
 0x6ed   : > { %v1456_v5 = vpop.eup %1455  ;;  %1328 = vmatmul.msk.f32.vlgmr.msrb.gmra.mxu0 %vm348_vm4, %v1454_v4  ;;  %v1096_v22 = vsel %vm348_vm4, %v1454_v4, 0.0 }
 0x6ee   : > { %1323 = vmatmul.msk.f32.vlgmr.msrb.gmra.mxu2 %vm348_vm4, %v1456_v5  ;;  %1097 = vadd.xlane.f32.xlu1 %v1096_v22  ;;  %v990_v6 = vsel %vm348_vm4, %v1456_v5, 0.0 }
 0x6ef   : > { %991 = vadd.xlane.f32.xlu2 %v990_v6 }
 0x761   : > { %v1098_v10 = vpop.xlane.xlu1 %1097 }
 0x762   : > { %1457 = vrcp.f32 %v1098_v10  ;;  %v992_v11 = vpop.xlane.xlu2 %991  ;;  %v1136_v17 = vand.u32 2147483648, %v1098_v10  ;;  %v1134_v8 = vand.u32 2147483647, %v1098_v10  ;;  %vm1130_vm7 = vweird.f32 %v1098_v10 }
 0x763   : > { %1459 = vrcp.f32 %v992_v11  ;;  %v1030_v20 = vand.u32 2147483648, %v992_v11  ;;  %v1028_v23 = vand.u32 2147483647, %v992_v11  ;;  %vm1024_vm2 = vweird.f32 %v992_v11 }
 0x764   : > { %v1137_v25 = vor.u32 1.1754944e-38, %v1136_v17  ;;  %vm1135_vm9 = vcmp.eq.f32.partialorder %v1134_v8, 8.507059e+37 }
 0x765   : > { %v1031_v28 = vor.u32 1.1754944e-38, %v1030_v20  ;;  %vm1029_vm11 = vcmp.eq.f32.partialorder %v1028_v23, 8.507059e+37 }
 0x768   : > { %v1458_v12 = vpop.eup %1457 }
 0x769   : > { %v1460_v13 = vpop.eup %1459  ;;  %v1126_v14 = vmul.f32 %v1458_v12, %v1098_v10  ;;  %vm1131_vm3 = vweird.f32 %v1458_v12 }
 0x76a   : > { %v1020_v15 = vmul.f32 %v1460_v13, %v992_v11  ;;  %vm1025_vm4 = vweird.f32 %v1460_v13  ;;  %vm1132_vm8 = vmor %vm1130_vm7, %vm1131_vm3  ;;  %v1122_v29 = vpop.f32.mrf.mxu0 }
 0x76b   : > { %v1127_v16 = vsub.f32 1.0, %v1126_v14  ;;  %vm1026_vm10 = vmor %vm1024_vm2, %vm1025_vm4 }
 0x76c   : > { %v1021_v18 = vsub.f32 1.0, %v1020_v15 }
 0x76d   : > { %v1128_v19 = vmul.f32 %v1458_v12, %v1127_v16 }
 0x76e   : > { %v1022_v21 = vmul.f32 %v1460_v13, %v1021_v18 }
 0x76f   : > { %v1129_v24 = vadd.f32 %v1458_v12, %v1128_v19 }
 0x770   : > { %v1023_v26 = vadd.f32 %v1460_v13, %v1022_v21 }
 0x771   : > { %v1133_v27 = vsel %vm1132_vm8, %v1458_v12, %v1129_v24  ;;  %v1016_v32 = vpop.f32.mrf.mxu2 }
 0x772   : > { %v1138_v7 = vsel %vm1135_vm9, %v1137_v25, %v1133_v27  ;;  %v1027_v30 = vsel %vm1026_vm10, %v1460_v13, %v1023_v26 }
 0x773   : > { %v1139_v31 = vmul.f32 %v1138_v7, %v1122_v29  ;;  %v1032_v33 = vsel %vm1029_vm11, %v1031_v28, %v1027_v30 }
 0x774   : > { %v1033_v34 = vmul.f32 %v1032_v33, %v1016_v32 }
 0x775   : > { %1330 = vmatmul.msk.f32.vlgmr.msra.gmra.mxu2 %vm321_vm1, %v1139_v31 }
 0x776   : > { %1325 = vmatmul.msk.f32.vlgmr.msrb.gmra.mxu1 %vm321_vm1, %v1033_v34 }
 0x7f3   : > { %v1057_v35 = vpop.f32.mrf.mxu1 }
 0x7f4   : > { %v1060_v36 = vadd.f32 %v1057_v35, %v1909_v54 }
 0x7f8   : > { %v1163_v38 = vpop.f32.mrf.mxu2 }
 0x7f9   : > { %v1166_v39 = vadd.f32 %v1163_v38, %v1060_v36 }
 0x7fb   : > { %v1171_v40 = vadd.f32 %v1428_v37, %v1166_v39 }
 0x7fd   : > { %1172 = vst.msk [vmem:[%s274_s9] sm:$0xff] %vm284_vm0, %v1171_v40 }
 0x7fe   : > { %1578 = shalt.err (!%p1575_p9)
}
 0x7ff   : > { %1345 = dma.vmem_to_hbm [thread:$0]  (%p1749_p4), %s1187_s10, 128, %s1189_s11, %s1174_s25  }
 0x800 PF: > { %s1200_s22 = sand.u32 1, %s1609_s18   ;;  %p1979_p10 = scmp.ge.s32.totalorder %s1621_s21, 2 }
 0x801   : > { %s1201_s7 = scalar_lea.sflag [#allocation4], %s1200_s22 }
 0x802   : > { %p1359_p13 = pnand %p1979_p10, %p1753_p6 }
 0x804   : > { %p1360_p11 = pneg %p1359_p13 }
 0x806   : > { %1604 = dma.done.wait (%p1360_p11), %s1201_s7, 128  }
 0x807   : > { %1606 = vsyncadd (%p1360_p11), %s1201_s7, 4294967168  ;;  %p19_p0 = scmp.ge.s32.totalorder %s1723_s12, 4   ;;  %s1980_s18 = smov %s1613_s19 }
 0x808   : > { %s1981_s19 = smov %s1617_s20  ;;  %s1982_s20 = smov %s1734_s15 }
 0x809   : > { %s1983_s21 = smov %s1723_s12  ;;  %21 = sbr.rel (!%p19_p0) target bundleno = 6 (0x6), region = 93 }
 0x80e   :  { %1207 = vsyncpa [#allocation3], 1 }
 0x80f   :  { %1209 = vsyncpa [#allocation3 + $0x1], 1 }
 0x810   :  { %1210 = vsyncpa [#allocation6], 1 }
 0x811   :  { %1211 = vsyncpa [#allocation4], 1 }
 0x812   :  { %1213 = vsyncpa [#allocation4 + $0x1], 1 }

</bundles_post_ra>
